<compile_context>
chip_gen: v6e
topology: v6e:2x2x1
jax: 0.10.0
libtpu: 0.0.40
codegen_flags: <defaults>
</compile_context>

<pallas_src>
import functools

import jax
import jax.numpy as jnp
from jax.experimental import pallas as pl
from jax.experimental.pallas import tpu as pltpu


def _pick_tile(n, target=128):
    """Largest divisor of n that is <= target (never the huge full dim), sublane-friendly."""
    if n <= target:
        return n
    divisors = [t for t in range(1, target + 1) if n % t == 0]
    for mult in (16, 8, 1):
        good = [t for t in divisors if t % mult == 0]
        if good:
            return max(good)
    return n


def _vmem_limit_bytes():
    """Chip-aware scoped-VMEM budget (v7x-class cores only have 64 MiB)."""
    try:
        cap = int(pltpu.get_tpu_info().vmem_capacity_bytes)
    except Exception:
        return 32 * 1024 * 1024          # conservative: fits every TPU generation
    if cap <= 64 * 1024 * 1024:
        return 40 * 1024 * 1024          # v7x-class
    return 96 * 1024 * 1024              # v5e / v6e (128 MiB physical)


# --------------------- kernel 1: (optional pre-LN) + single fused Q/K/V projection --------------

def _qkv_kernel(x_ref, wqkv_ref, g_ref, b_ref, q_ref, k_ref, v_ref, *,
                n_head, d_head, pre_ln):
    x = x_ref[...]                                        # [tq, d_model] f32
    if pre_ln:
        mu = jnp.mean(x, axis=-1, keepdims=True)
        xc = x - mu
        var = jnp.mean(xc * xc, axis=-1, keepdims=True)
        x = xc * jax.lax.rsqrt(var + 1e-5) * g_ref[...] + b_ref[...]

    # One wide matmul [tq, d_model] x [d_model, 3*H*D] (bf16 MXU inputs, f32 accumulation).
    heads = jax.lax.dot_general(
        x.astype(jnp.bfloat16), wqkv_ref[...],
        dimension_numbers=(((1,), (1,)), ((), ())),
        preferred_element_type=jnp.float32)               # [tq, 3*H*D]

    HD = n_head * d_head
    q_ref[...] = heads[:, :HD].astype(q_ref.dtype)        # q stays lane-dense [tq, H*D]
    for h in range(n_head):                               # k/v written head-major
        k_ref[h] = heads[:, HD + h * d_head: HD + (h + 1) * d_head].astype(k_ref.dtype)
        v_ref[h] = heads[:, 2 * HD + h * d_head: 2 * HD + (h + 1) * d_head].astype(v_ref.dtype)


def qkv_project(w_bm, wqkv, ln_g, ln_b, *, n_head, d_head, pre_ln, vmem_limit):
    bsz, qlen, d_model = w_bm.shape
    HD = n_head * d_head
    tq = _pick_tile(qlen, 256)
    n_qt = qlen // tq
    kernel = functools.partial(_qkv_kernel, n_head=n_head, d_head=d_head, pre_ln=pre_ln)
    return pl.pallas_call(
        kernel,
        grid=(bsz, n_qt),
        in_specs=[
            pl.BlockSpec((None, tq, d_model), lambda b, t: (b, t, 0)),
            pl.BlockSpec((3 * HD, d_model), lambda b, t: (0, 0)),
            pl.BlockSpec((1, d_model), lambda b, t: (0, 0)),
            pl.BlockSpec((1, d_model), lambda b, t: (0, 0)),
        ],
        out_specs=(
            pl.BlockSpec((None, tq, HD), lambda b, t: (b, t, 0)),
            pl.BlockSpec((None, n_head, tq, d_head), lambda b, t: (b, 0, t, 0)),
            pl.BlockSpec((None, n_head, tq, d_head), lambda b, t: (b, 0, t, 0)),
        ),
        out_shape=(
            jax.ShapeDtypeStruct((bsz, qlen, HD), jnp.bfloat16),
            jax.ShapeDtypeStruct((bsz, n_head, qlen, d_head), jnp.bfloat16),
            jax.ShapeDtypeStruct((bsz, n_head, qlen, d_head), jnp.bfloat16),
        ),
        compiler_params=pltpu.CompilerParams(
            dimension_semantics=("parallel", "parallel"),
            vmem_limit_bytes=vmem_limit),
    )(w_bm, wqkv, ln_g, ln_b)


# --------------------------------- kernel 2: r projection (head-major) --------------------------

def _r_proj_kernel(r_ref, w_ref, rk_ref, *, n_head, d_head):
    heads = jax.lax.dot_general(
        r_ref[...].astype(jnp.bfloat16), w_ref[...],
        dimension_numbers=(((1,), (1,)), ((), ())),
        preferred_element_type=jnp.float32)               # [tr, H*D]
    for h in range(n_head):
        rk_ref[h] = heads[:, h * d_head:(h + 1) * d_head].astype(rk_ref.dtype)


def r_project(r, rw, *, n_head, d_head, vmem_limit):
    rlen, d_model = r.shape
    HD = n_head * d_head
    tr = _pick_tile(rlen, 256)
    kernel = functools.partial(_r_proj_kernel, n_head=n_head, d_head=d_head)
    return pl.pallas_call(
        kernel,
        grid=(rlen // tr,),
        in_specs=[pl.BlockSpec((tr, d_model), lambda i: (i, 0)),
                  pl.BlockSpec((HD, d_model), lambda i: (0, 0))],
        out_specs=pl.BlockSpec((n_head, tr, d_head), lambda i: (0, i, 0)),
        out_shape=jax.ShapeDtypeStruct((n_head, rlen, d_head), jnp.bfloat16),
        compiler_params=pltpu.CompilerParams(
            dimension_semantics=("parallel",),
            vmem_limit_bytes=vmem_limit),
    )(r, rw)


# --------- kernel 3: fused relative attention (AC + BD + shift + softmax + PV + o_net + LN) -----

def _rel_attn_kernel(q_ref, k_ref, v_ref, rk_ref, rwb_ref, rrb_ref, ow_ref,
                     res_ref, g_ref, b_ref, o_ref, acc_ref, *,
                     n_head, d_head, scale, q_tile, klen, rlen, n_q_tiles, apply_ln):
    qt = pl.program_id(1)

    q = q_ref[...].astype(jnp.float32)                    # [tq, H*D]
    # Hoisted bias adds (one pass over the packed tile, not per head).
    rwq_all = (q + rwb_ref[...]).astype(jnp.bfloat16)
    rrq_all = (q + rrb_ref[...]).astype(jnp.bfloat16)

    local_row = jax.lax.broadcasted_iota(jnp.int32, (q_tile, 1), 0)       # [tq, 1]
    row = qt * q_tile + local_row
    col = jax.lax.broadcasted_iota(jnp.int32, (q_tile, klen), 1)          # [tq, klen]
    causal = col > row        # canonical Transformer-XL dec_attn_mask with mems=None
    neg = jnp.float32(-1e30)

    def roll_lanes(x, sh):    # static right-roll along the last axis
        n = x.shape[-1]
        sh = sh % n
        if sh == 0:
            return x
        if n % 128 == 0:
            return pltpu.roll(x, shift=sh, axis=-1)       # XLU rotate slot (co-issues)
        return jnp.concatenate([x[..., -sh:], x[..., :-sh]], axis=-1)     # tiny-shape fallback

    # Per-row right-roll amount for rel_shift: row + 1 = (qt*tq + 1) + local_row.
    use_dyn_preroll = (n_q_tiles > 1) and (rlen % 128 == 0)
    if n_q_tiles == 1 or use_dyn_preroll:
        shift_vec = local_row
        nbits = max((q_tile - 1).bit_length(), 0)         # only local-row bits
    else:
        shift_vec = row + 1                                # fallback: full barrel shifter
        nbits = max(int(rlen).bit_length(), 1)
    pre = (qt * q_tile + 1) % rlen                         # tile-constant scalar

    for h in range(n_head):
        lo, hi = h * d_head, (h + 1) * d_head
        k_h = k_ref[h]            # [klen, D] bf16 (leading-axis head select: no lane relayout)
        v_h = v_ref[h]
        rk_h = rk_ref[h]          # [rlen, D] bf16 (shared across batch)

        ac = jax.lax.dot_general(rwq_all[:, lo:hi], k_h,
                                 dimension_numbers=(((1,), (1,)), ((), ())),
                                 preferred_element_type=jnp.float32)      # [tq, klen]
        bd = jax.lax.dot_general(rrq_all[:, lo:hi], rk_h,
                                 dimension_numbers=(((1,), (1,)), ((), ())),
                                 preferred_element_type=jnp.float32)      # [tq, rlen]

        # In-kernel rel_shift.  (Values at masked positions j > i are implementation-defined,
        # exactly as in torch's pad-trick; the causal mask removes them in both.)
        if n_q_tiles == 1:
            bd = roll_lanes(bd, 1)                         # static tile-constant part (+1)
        elif use_dyn_preroll:
            bd = pltpu.roll(bd, shift=pre, axis=-1)        # one dynamic XLU rotate per head
        for kb in range(nbits):                            # barrel shifter over remaining bits
            sh = (1 << kb) % rlen
            if sh == 0:
                continue
            bd = jnp.where(((shift_vec >> kb) & 1) == 1, roll_lanes(bd, sh), bd)

        score = (ac + bd) * scale
        score = jnp.where(causal, neg, score)
        m = jnp.max(score, axis=-1, keepdims=True)
        p = jnp.exp(score - m)
        denom = jnp.sum(p, axis=-1, keepdims=True)
        prob = p * pl.reciprocal(denom, approx=True)       # EUP reciprocal, effectively free

        # Write each head's result immediately into the VMEM accumulator (bounds live ranges).
        acc_ref[:, lo:hi] = jnp.dot(prob.astype(jnp.bfloat16), v_h,
                                    preferred_element_type=jnp.float32)

    # Fused epilogue: o_net + residual (+ post-layernorm), lane-dense [tq, d_model] store.
    av = acc_ref[...].astype(jnp.bfloat16)
    y = jax.lax.dot_general(av, ow_ref[...],
                            dimension_numbers=(((1,), (1,)), ((), ())),
                            preferred_element_type=jnp.float32)           # [tq, d_model]
    z = y + res_ref[...]
    if apply_ln:
        mu = jnp.mean(z, axis=-1, keepdims=True)
        zc = z - mu
        var = jnp.mean(zc * zc, axis=-1, keepdims=True)
        z = zc * jax.lax.rsqrt(var + 1e-5) * g_ref[...] + b_ref[...]
    o_ref[...] = z.astype(o_ref.dtype)


def rel_attention(q, k, v, rk, rwb, rrb, ow, resid, ln_g, ln_b, *,
                  n_head, d_head, scale, apply_ln, vmem_limit, q_tile_target):
    bsz, qlen, HD = q.shape
    klen = k.shape[2]
    rlen = rk.shape[1]
    d_model = ow.shape[0]
    tq = _pick_tile(qlen, q_tile_target)
    n_qt = qlen // tq

    kernel = functools.partial(
        _rel_attn_kernel, n_head=n_head, d_head=d_head, scale=scale,
        q_tile=tq, klen=klen, rlen=rlen, n_q_tiles=n_qt, apply_ln=apply_ln)

    flops = (2 * bsz * n_head * qlen * d_head * (2 * klen + rlen)
             + 2 * bsz * qlen * HD * d_model)
    cost = pl.CostEstimate(
        flops=int(flops),
        transcendentals=int(bsz * n_head * qlen * klen),
        bytes_accessed=int(2 * (q.size + k.size + v.size + rk.size + ow.size)
                           + 4 * (resid.size + bsz * qlen * d_model)))

    return pl.pallas_call(
        kernel,
        grid=(bsz, n_qt),
        in_specs=[
            pl.BlockSpec((None, tq, HD), lambda b, t: (b, t, 0)),                   # q tile
            pl.BlockSpec((None, n_head, klen, d_head), lambda b, t: (b, 0, 0, 0)),  # k (head-major)
            pl.BlockSpec((None, n_head, klen, d_head), lambda b, t: (b, 0, 0, 0)),  # v (head-major)
            pl.BlockSpec((n_head, rlen, d_head), lambda b, t: (0, 0, 0)),           # r_head_k
            pl.BlockSpec((1, HD), lambda b, t: (0, 0)),                             # r_w_bias
            pl.BlockSpec((1, HD), lambda b, t: (0, 0)),                             # r_r_bias
            pl.BlockSpec((d_model, HD), lambda b, t: (0, 0)),                       # o_net weight
            pl.BlockSpec((None, tq, d_model), lambda b, t: (b, t, 0)),              # residual
            pl.BlockSpec((1, d_model), lambda b, t: (0, 0)),                        # ln gamma
            pl.BlockSpec((1, d_model), lambda b, t: (0, 0)),                        # ln beta
        ],
        out_specs=pl.BlockSpec((None, tq, d_model), lambda b, t: (b, t, 0)),
        out_shape=jax.ShapeDtypeStruct((bsz, qlen, d_model), jnp.float32),
        scratch_shapes=[pltpu.VMEM((tq, HD), jnp.float32)],
        compiler_params=pltpu.CompilerParams(
            dimension_semantics=("parallel", "parallel"),
            vmem_limit_bytes=vmem_limit),
        cost_estimate=cost,
    )(q, k, v, rk, rwb, rrb, ow, resid, ln_g, ln_b)
    # TODO(synk): K-axis online-softmax tiling for very long klen (whole-seq K/V residency here).


# ------------------------------------------ forward ---------------------------------------------

def rel_multi_head_attn_forward(w, r, params, *, n_head, d_head,
                                pre_lnorm=False, attn_mask=None, mems=None):
    # TODO(synk): mems (recurrence memory concat) path not implemented; klen == qlen assumed.
    assert mems is None
    qlen, bsz, d_model = w.shape
    rlen = r.shape[0]
    assert rlen == qlen
    HD = n_head * d_head
    scale = 1.0 / (d_head ** 0.5)

    # TODO(synk): the fused kernel always applies the canonical causal mask in-kernel
    # (Transformer-XL dec_attn_mask with mems=None); arbitrary attn_mask values are not supported.
    del attn_mask

    vmem_limit = _vmem_limit_bytes()
    q_tile_target = 256 if vmem_limit >= 96 * 1024 * 1024 else 128

    ln_g = params["ln_g"].reshape(1, d_model).astype(jnp.float32)
    ln_b = params["ln_b"].reshape(1, d_model).astype(jnp.float32)
    wqkv = params["qkv_w"].astype(jnp.bfloat16)            # [3*HD, d_model]
    rw = params["r_w"].astype(jnp.bfloat16)                # [HD, d_model]
    ow = params["o_w"].astype(jnp.bfloat16)                # [d_model, HD]
    rwb = params["r_w_bias"].reshape(1, HD).astype(jnp.float32)
    rrb = params["r_r_bias"].reshape(1, HD).astype(jnp.float32)

    # Batch-major internal layout (single transpose in / out).
    w_bm = jnp.transpose(w, (1, 0, 2)).astype(jnp.float32)  # [bsz, qlen, d_model]

    q, k, v = qkv_project(w_bm, wqkv, ln_g, ln_b, n_head=n_head, d_head=d_head,
                          pre_ln=pre_lnorm, vmem_limit=vmem_limit)
    rk = r_project(r.astype(jnp.float32), rw, n_head=n_head, d_head=d_head,
                   vmem_limit=vmem_limit)                   # [n_head, rlen, d_head] bf16

    out_bm = rel_attention(q, k, v, rk, rwb, rrb, ow, w_bm, ln_g, ln_b,
                           n_head=n_head, d_head=d_head, scale=scale,
                           apply_ln=not pre_lnorm, vmem_limit=vmem_limit,
                           q_tile_target=q_tile_target)     # [bsz, qlen, d_model] f32
    return jnp.transpose(out_bm, (1, 0, 2))


# ------------------------------------ pure-JAX reference ----------------------------------------

def _rel_shift(x):
    # Exact mirror of torch _rel_shift (zero-pad + view trick).
    qlen, klen = x.shape[0], x.shape[1]
    zero_pad = jnp.zeros((qlen, 1) + x.shape[2:], dtype=x.dtype)
    x_padded = jnp.concatenate([zero_pad, x], axis=1)
    x_padded = x_padded.reshape((klen + 1, qlen) + x.shape[2:])
    return x_padded[1:].reshape(x.shape)


def reference_forward(w, r, params, *, n_head, d_head, pre_lnorm=False, attn_mask=None):
    qlen, bsz, d_model = w.shape
    rlen = r.shape[0]
    scale = 1.0 / (d_head ** 0.5)

    def ln(x):
        mu = jnp.mean(x, axis=-1, keepdims=True)
        var = jnp.mean((x - mu) ** 2, axis=-1, keepdims=True)
        return (x - mu) / jnp.sqrt(var + 1e-5) * params["ln_g"] + params["ln_b"]

    w_in = ln(w) if pre_lnorm else w
    w_heads = w_in @ params["qkv_w"].T
    r_head_k = (r @ params["r_w"].T).reshape(rlen, n_head, d_head)
    w_head_q, w_head_k, w_head_v = jnp.split(w_heads, 3, axis=-1)
    w_head_q = w_head_q.reshape(qlen, bsz, n_head, d_head)
    w_head_k = w_head_k.reshape(qlen, bsz, n_head, d_head)
    w_head_v = w_head_v.reshape(qlen, bsz, n_head, d_head)

    rw_q = w_head_q + params["r_w_bias"]
    rr_q = w_head_q + params["r_r_bias"]
    AC = jnp.einsum("ibnd,jbnd->ijbn", rw_q, w_head_k)
    BD = _rel_shift(jnp.einsum("ibnd,jnd->ijbn", rr_q, r_head_k))
    score = (AC + BD) * scale
    if attn_mask is not None:
        score = jnp.where(attn_mask[:, :, None, None], -jnp.inf, score)
    prob = jax.nn.softmax(score, axis=1)
    attn_vec = jnp.einsum("ijbn,jbnd->ibnd", prob, w_head_v).reshape(qlen, bsz, n_head * d_head)
    attn_out = attn_vec @ params["o_w"].T
    if pre_lnorm:
        return w + attn_out
    return ln(w + attn_out)


# ----------------------------------------------- demo -------------------------------------------

if __name__ == "__main__":
    n_head, d_head, d_model = 2, 16, 32
    qlen, bsz = 8, 2
    rlen = qlen

    key = jax.random.PRNGKey(0)
    ks = jax.random.split(key, 8)
    params = {
        "qkv_w":    0.02 * jax.random.normal(ks[0], (3 * n_head * d_head, d_model), jnp.float32),
        "o_w":      0.02 * jax.random.normal(ks[1], (d_model, n_head * d_head), jnp.float32),
        "r_w":      0.02 * jax.random.normal(ks[2], (n_head * d_head, d_model), jnp.float32),
        "r_w_bias": 0.02 * jax.random.normal(ks[3], (n_head, d_head), jnp.float32),
        "r_r_bias": 0.02 * jax.random.normal(ks[4], (n_head, d_head), jnp.float32),
        "ln_g":     jnp.ones((d_model,), jnp.float32),
        "ln_b":     jnp.zeros((d_model,), jnp.float32),
    }
    w = jax.random.normal(ks[5], (qlen, bsz, d_model), jnp.float32)
    r = jax.random.normal(ks[6], (rlen, d_model), jnp.float32)
    attn_mask = jnp.triu(jnp.ones((qlen, qlen), jnp.float32), 1).astype(bool)  # causal

    for pre_lnorm in (False, True):
        out = rel_multi_head_attn_forward(w, r, params, n_head=n_head, d_head=d_head,
                                          pre_lnorm=pre_lnorm, attn_mask=attn_mask, mems=None)
        out = jax.block_until_ready(out)
        ref = reference_forward(w, r, params, n_head=n_head, d_head=d_head,
                                pre_lnorm=pre_lnorm, attn_mask=attn_mask)
        assert out.shape == (qlen, bsz, d_model)
        err = float(jnp.max(jnp.abs(out - ref)))
        assert bool(jnp.allclose(out, ref, atol=3e-2, rtol=3e-2)), (pre_lnorm, err)

    print("KERNEL_OK")
</pallas_src>

<mosaic_0001>
module attributes {stable_mosaic.version = 11 : i64} {
  func.func @_qkv_kernel(%arg0: i32, %arg1: i32, %arg2: memref<1x8x32xf32, #tpu.memory_space<vmem>>, %arg3: memref<96x32xbf16, #tpu.memory_space<vmem>>, %arg4: memref<1x32xf32, #tpu.memory_space<vmem>>, %arg5: memref<1x32xf32, #tpu.memory_space<vmem>>, %arg6: memref<1x8x32xbf16, #tpu.memory_space<vmem>>, %arg7: memref<1x2x8x16xbf16, #tpu.memory_space<vmem>>, %arg8: memref<1x2x8x16xbf16, #tpu.memory_space<vmem>>) attributes {dimension_semantics = [#tpu.dimension_semantics<parallel>, #tpu.dimension_semantics<parallel>], iteration_bounds = array<i64: 2, 1>, scalar_prefetch = 0 : i64, scratch_operands = 0 : i64, tpu.core_type = #tpu.core_type<tc>, window_params = [{transform_indices = @transform_0, window_bounds = array<i64: 1, 8, 32>}, {pipeline_mode = #tpu.pipeline_mode<synchronous>, transform_indices = @transform_1, window_bounds = array<i64: 96, 32>}, {pipeline_mode = #tpu.pipeline_mode<synchronous>, transform_indices = @transform_2, window_bounds = array<i64: 1, 32>}, {pipeline_mode = #tpu.pipeline_mode<synchronous>, transform_indices = @transform_3, window_bounds = array<i64: 1, 32>}, {transform_indices = @transform_4, window_bounds = array<i64: 1, 8, 32>}, {transform_indices = @transform_5, window_bounds = array<i64: 1, 2, 8, 16>}, {transform_indices = @transform_6, window_bounds = array<i64: 1, 2, 8, 16>}]} {
    %c0 = arith.constant 0 : index
    %c0_0 = arith.constant 0 : index
    %c0_1 = arith.constant 0 : index
    %0 = vector.load %arg2[%c0, %c0_0, %c0_1] : memref<1x8x32xf32, #tpu.memory_space<vmem>>, vector<1x8x32xf32>
    %1 = vector.shape_cast %0 : vector<1x8x32xf32> to vector<8x32xf32>
    %2 = arith.truncf %1 : vector<8x32xf32> to vector<8x32xbf16>
    %c0_2 = arith.constant 0 : index
    %c0_3 = arith.constant 0 : index
    %3 = vector.load %arg3[%c0_2, %c0_3] : memref<96x32xbf16, #tpu.memory_space<vmem>>, vector<96x32xbf16>
    %cst = arith.constant dense<0.000000e+00> : vector<8x96xf32>
    %4 = tpu.matmul %2, %3, %cst {dimension_numbers = #tpu.dot_dimension_numbers<[1], [1], [0], [0], [0, 0, 1, 0], [], []>} : vector<8x32xbf16>, vector<96x32xbf16>, vector<8x96xf32> -> vector<8x96xf32>
    %5 = vector.extract_strided_slice %4 {offsets = [0, 0], sizes = [8, 32], strides = [1, 1]} : vector<8x96xf32> to vector<8x32xf32>
    %6 = arith.truncf %5 : vector<8x32xf32> to vector<8x32xbf16>
    %c0_4 = arith.constant 0 : index
    %c0_5 = arith.constant 0 : index
    %c0_6 = arith.constant 0 : index
    %7 = vector.load %arg6[%c0_4, %c0_5, %c0_6] : memref<1x8x32xbf16, #tpu.memory_space<vmem>>, vector<1x8x32xbf16>
    %8 = vector.shape_cast %7 : vector<1x8x32xbf16> to vector<8x32xbf16>
    %9 = vector.shape_cast %6 : vector<8x32xbf16> to vector<1x8x32xbf16>
    tpu.vector_store %arg6[%c0_4, %c0_5, %c0_6], %9 {strides = array<i32>} : memref<1x8x32xbf16, #tpu.memory_space<vmem>>, vector<1x8x32xbf16>,
    %10 = vector.extract_strided_slice %4 {offsets = [0, 32], sizes = [8, 16], strides = [1, 1]} : vector<8x96xf32> to vector<8x16xf32>
    %11 = arith.truncf %10 : vector<8x16xf32> to vector<8x16xbf16>
    %c0_7 = arith.constant 0 : index
    %c0_8 = arith.constant 0 : index
    %c0_9 = arith.constant 0 : index
    %c0_10 = arith.constant 0 : index
    %12 = vector.load %arg7[%c0_7, %c0_8, %c0_9, %c0_10] : memref<1x2x8x16xbf16, #tpu.memory_space<vmem>>, vector<1x1x8x16xbf16>
    %13 = vector.shape_cast %12 : vector<1x1x8x16xbf16> to vector<8x16xbf16>
    %14 = vector.shape_cast %11 : vector<8x16xbf16> to vector<1x1x8x16xbf16>
    tpu.vector_store %arg7[%c0_7, %c0_8, %c0_9, %c0_10], %14 {strides = array<i32>} : memref<1x2x8x16xbf16, #tpu.memory_space<vmem>>, vector<1x1x8x16xbf16>,
    %15 = vector.extract_strided_slice %4 {offsets = [0, 64], sizes = [8, 16], strides = [1, 1]} : vector<8x96xf32> to vector<8x16xf32>
    %16 = arith.truncf %15 : vector<8x16xf32> to vector<8x16xbf16>
    %c0_11 = arith.constant 0 : index
    %c0_12 = arith.constant 0 : index
    %c0_13 = arith.constant 0 : index
    %c0_14 = arith.constant 0 : index
    %17 = vector.load %arg8[%c0_11, %c0_12, %c0_13, %c0_14] : memref<1x2x8x16xbf16, #tpu.memory_space<vmem>>, vector<1x1x8x16xbf16>
    %18 = vector.shape_cast %17 : vector<1x1x8x16xbf16> to vector<8x16xbf16>
    %19 = vector.shape_cast %16 : vector<8x16xbf16> to vector<1x1x8x16xbf16>
    tpu.vector_store %arg8[%c0_11, %c0_12, %c0_13, %c0_14], %19 {strides = array<i32>} : memref<1x2x8x16xbf16, #tpu.memory_space<vmem>>, vector<1x1x8x16xbf16>,
    %20 = vector.extract_strided_slice %4 {offsets = [0, 48], sizes = [8, 16], strides = [1, 1]} : vector<8x96xf32> to vector<8x16xf32>
    %21 = arith.truncf %20 : vector<8x16xf32> to vector<8x16xbf16>
    %c0_15 = arith.constant 0 : index
    %c1 = arith.constant 1 : index
    %c0_16 = arith.constant 0 : index
    %c0_17 = arith.constant 0 : index
    %22 = vector.load %arg7[%c0_15, %c1, %c0_16, %c0_17] : memref<1x2x8x16xbf16, #tpu.memory_space<vmem>>, vector<1x1x8x16xbf16>
    %23 = vector.shape_cast %22 : vector<1x1x8x16xbf16> to vector<8x16xbf16>
    %24 = vector.shape_cast %21 : vector<8x16xbf16> to vector<1x1x8x16xbf16>
    tpu.vector_store %arg7[%c0_15, %c1, %c0_16, %c0_17], %24 {strides = array<i32>} : memref<1x2x8x16xbf16, #tpu.memory_space<vmem>>, vector<1x1x8x16xbf16>,
    %25 = vector.extract_strided_slice %4 {offsets = [0, 80], sizes = [8, 16], strides = [1, 1]} : vector<8x96xf32> to vector<8x16xf32>
    %26 = arith.truncf %25 : vector<8x16xf32> to vector<8x16xbf16>
    %c0_18 = arith.constant 0 : index
    %c1_19 = arith.constant 1 : index
    %c0_20 = arith.constant 0 : index
    %c0_21 = arith.constant 0 : index
    %27 = vector.load %arg8[%c0_18, %c1_19, %c0_20, %c0_21] : memref<1x2x8x16xbf16, #tpu.memory_space<vmem>>, vector<1x1x8x16xbf16>
    %28 = vector.shape_cast %27 : vector<1x1x8x16xbf16> to vector<8x16xbf16>
    %29 = vector.shape_cast %26 : vector<8x16xbf16> to vector<1x1x8x16xbf16>
    tpu.vector_store %arg8[%c0_18, %c1_19, %c0_20, %c0_21], %29 {strides = array<i32>} : memref<1x2x8x16xbf16, #tpu.memory_space<vmem>>, vector<1x1x8x16xbf16>,
    return
  }
  func.func @transform_0(%arg0: i32, %arg1: i32) -> (i32, i32, i32) {
    %c0_i32 = arith.constant 0 : i32
    %c0_i32_0 = arith.constant 0 : i32
    return %arg0, %arg1, %c0_i32 : i32, i32, i32
  }
  func.func @transform_1(%arg0: i32, %arg1: i32) -> (i32, i32) {
    %c0_i32 = arith.constant 0 : i32
    %c0_i32_0 = arith.constant 0 : i32
    %c0_i32_1 = arith.constant 0 : i32
    return %c0_i32, %c0_i32_0 : i32, i32
  }
  func.func @transform_2(%arg0: i32, %arg1: i32) -> (i32, i32) {
    %c0_i32 = arith.constant 0 : i32
    %c0_i32_0 = arith.constant 0 : i32
    %c0_i32_1 = arith.constant 0 : i32
    return %c0_i32, %c0_i32_0 : i32, i32
  }
  func.func @transform_3(%arg0: i32, %arg1: i32) -> (i32, i32) {
    %c0_i32 = arith.constant 0 : i32
    %c0_i32_0 = arith.constant 0 : i32
    %c0_i32_1 = arith.constant 0 : i32
    return %c0_i32, %c0_i32_0 : i32, i32
  }
  func.func @transform_4(%arg0: i32, %arg1: i32) -> (i32, i32, i32) {
    %c0_i32 = arith.constant 0 : i32
    %c0_i32_0 = arith.constant 0 : i32
    return %arg0, %arg1, %c0_i32 : i32, i32, i32
  }
  func.func @transform_5(%arg0: i32, %arg1: i32) -> (i32, i32, i32, i32) {
    %c0_i32 = arith.constant 0 : i32
    %c0_i32_0 = arith.constant 0 : i32
    %c0_i32_1 = arith.constant 0 : i32
    return %arg0, %c0_i32, %arg1, %c0_i32_0 : i32, i32, i32, i32
  }
  func.func @transform_6(%arg0: i32, %arg1: i32) -> (i32, i32, i32, i32) {
    %c0_i32 = arith.constant 0 : i32
    %c0_i32_0 = arith.constant 0 : i32
    %c0_i32_1 = arith.constant 0 : i32
    return %arg0, %c0_i32, %arg1, %c0_i32_0 : i32, i32, i32, i32
  }
}

</mosaic_0001>

<bundles_post_ra>
// kernel: tpu_custom_call.1
= control target key start
LH: loop header
LB: loop body
LE: loop exit
PB: predicated region body
PF: predicated region fallthrough
CT: control target
= control target key end

     0   :  { %12 = vsyncpa [#allocation3], 0  ;;  %s1155_s0 = inlined_call_operand.vmem [shape: f32[2,8,32], index: 0, kind: input, shape index: {}]   ;;  %s1156_s1 = inlined_call_operand.vmem [shape: bf16[96,32], index: 1, kind: input, shape index: {}]   ;;  %s1157_s2 = inlined_call_operand.vmem [shape: f32[1,32], index: 2, kind: input, shape index: {}]   ;;  %s1158_s3 = inlined_call_operand.vmem [shape: f32[1,32], index: 3, kind: input, shape index: {}]   ;;  %s1159_s4 = inlined_call_operand.hbm [shape: bf16[2,8,32], index: 4, kind: output, shape index: {0}]   ;;  %s1160_s5 = inlined_call_operand.hbm [shape: bf16[2,2,8,16], index: 5, kind: output, shape index: {1}]   ;;  %s1161_s6 = inlined_call_operand.hbm [shape: bf16[2,2,8,16], index: 6, kind: output, shape index: {2}]  }
   0x1   :  { %14 = vsyncpa [#allocation3 + $0x1], 0 }
   0x2   :  { %15 = vsyncpa [#allocation5], 0 }
   0x3   :  { %17 = vsyncpa [#allocation5 + $0x1], 0  ;;  %s933_s21 = smov 0   ;;  %s935_s22 = smov 0  }
   0x4   :  { %s937_s2 = smov 0   ;;  %s939_s3 = smov 0  }
   0x5   :  { %s941_s23 = smov 0   ;;  %s943_s24 = smov 0  }
   0x6 LB: > { %s621_s25 = sadd.s32 4294967295, %s886_s24   ;;  %s622_s26 = sadd.s32 4294967294, %s886_s24   ;;  %s886_s24 = sphi %s943_s24, %s23_s24   ;;  %s882_s23 = sphi %s941_s23, %s1168_s23   ;;  %s878_s3 = sphi %s939_s3, %s1167_s3   ;;  %s874_s2 = sphi %s937_s2, %s1166_s2   ;;  %s870_s22 = sphi %s935_s22, %s1165_s22   ;;  %s866_s21 = sphi %s933_s21, %s1164_s21  }
   0x7   : > { %s35_s27 = sadd.s32 1, %s882_s23  ;;  %s135_s28 = sadd.s32 1, %s874_s2 }
   0x8   : > { %p37_p0 = scmp.ge.s32.totalorder %s35_s27, 2  ;;  %p145_p1 = scmp.ne.s32.totalorder %s874_s2, %s870_s22 }
   0x9   : > { %p146_p2 = scmp.eq.s32.totalorder %s621_s25, 1  ;;  %p151_p3 = scmp.ne.s32.totalorder %s870_s22, %s866_s21 }
   0xa   : > { %s1170_s27 = smov (%p37_p0, %s35_s27), 0  ;;  %p152_p5 = scmp.eq.s32.totalorder %s622_s26, 1 }
   0xb   : > { %p975_p4 = por %p146_p2, %p145_p1  ;;  %s130_s30 = ssub.s32 %s882_s23, %s1170_s27 }
   0xc   : > { %p625_p6 = scmp.ge.s32.totalorder %s886_s24, 1  ;;  %p133_p7 = scmp.eq.s32.totalorder %s130_s30, 0 }
   0xd   : > { %p984_p8 = por %p152_p5, %p151_p3  ;;  %p245_p9 = scmp.lt.s32.totalorder %s886_s24, 3 }
   0xe   : > { %s990_s8 = scalar_select %p133_p7, %s874_s2, %s135_s28  }
   0xf   : > { %p246_p10 = pnand %p625_p6, %p245_p9 }
  0x10   : > { %p287_p11 = scmp.lt.s32.totalorder (!%p246_p10), %s878_s3, 1  ;;  %s1023_s12 = sand.u32 (!%p246_p10), 1, %s870_s22  }
  0x11   : > { %249 = sbr.rel (%p246_p10) target bundleno = 431 (0x1af), region = 36  ;;  %s626_s13 = sshll.u32 (!%p246_p10), %s1023_s12, 2 }
  0x12   : > { %s643_s14 = sshll.u32 (!%p246_p10), %s878_s3, 6  ;;  %s272_s15 = scalar_lea.vmem (!%p246_p10), [#allocation2], %s626_s13 }
  0x13   : > { %s451_s16 = sshll.u32 (!%p246_p10), %s272_s15, 4  ;;  %s890_s20 = smov (!%p246_p10), 64   ;;  %s1032_s16 = int_to_ptr.vmem [resolvable:$true] %s451_s16 }
  0x14   : > { %s891_s28 = smov (!%p246_p10), 96   ;;  %s754_s9 = scalar_lea.vmem (!%p246_p10), %s1032_s16, 64 }
  0x15   : > { %p755_p12 = scmp.ne.s32.totalorder (!%p246_p10), %s1032_s16, %s754_s9  ;;  %s892_s10 = smov (!%p246_p10), [#allocation2]  }
  0x16   : > { %v748_v0 = vld [vmem:[%s1156_s1 + $0x28] sm:$0xff]   ;;  %v888_v1 = vmov 0.0   ;;  %vm339_vm0 = vcmask 261120   ;;  %v749_v3 = vld [vmem:[%s1156_s1 + $0x20] sm:$0xff]   ;;  %vm889_vm1 = vmmov 0   ;;  %v750_v5 = vld [vmem:[%s1156_s1 + $0x18] sm:$0xff]  }
  0x17   : > { %660 = vmatprep.subr.bf16.mxu0 %v888_v1  ;;  %v359_v2 = vsel %vm339_vm0, %v748_v0, 0  ;;  %672 = vmatprep.mubr.msk.bf16.mxu0 %vm889_vm1, %v888_v1  ;;  %v356_v4 = vsel %vm339_vm0, %v749_v3, 0  ;;  %v353_v6 = vsel %vm339_vm0, %v750_v5, 0  ;;  %v751_v7 = vld [vmem:[%s1156_s1 + $0x10] sm:$0xff]   ;;  %v752_v9 = vld [vmem:[%s1156_s1 + $0x8] sm:$0xff]   ;;  %s288_s19 = scalar_select %p287_p11, %s878_s3, 1 }
  0x18   : > { %661 = vmatpush3.bf16.xpose.msra.mxu0 %v359_v2  ;;  %v350_v8 = vsel %vm339_vm0, %v751_v7, 0  ;;  %v347_v10 = vsel %vm339_vm0, %v752_v9, 0  ;;  %v753_v11 = vld [vmem:[%s1156_s1] sm:$0xff]   ;;  %vm402_vm2 = vcmask 257024   ;;  %p756_p13 = pnand %p755_p12, %p975_p4 }
  0x19   : > { %662 = vmatprep.subr.bf16.mxu0 %v888_v1  ;;  %s629_s30 = sshll.u32 %s288_s19, 3  ;;  %v344_v12 = vsel %vm339_vm0, %v753_v11, 0  ;;  %s1030_s19 = scalar_lea.hbm %s1159_s4, %s643_s14 }
  0x1a   : > { %s293_s11 = scalar_lea.vmem %s1155_s0, %s629_s30  ;;  %s427_s30 = scalar_lea.sflag [#allocation3], %s1023_s12 }
  0x1b   : > { %v295_v13 = vld [vmem:[%s293_s11] sm:$0xff]  ;;  %p757_p0 = pneg %p756_p13  ;;  %s758_s11 = sshll.u32 %s892_s10, 4  ;;  %s759_s11 = int_to_ptr.vmem [resolvable:$false] %s758_s11 }
  0x1c   : > { %v296_v14 = vpack.c.bf16 %v295_v13, %v295_v13  ;;  %s760_s13 = scalar_lea.vmem %s759_s11, 128  ;;  %p761_p1 = scmp.lt.s32.totalorder %s1032_s16, %s759_s11 }
  0x1d   : > { %p762_p2 = scmp.lt.s32.totalorder %s760_s13, %s754_s9 }
  0x1f   : > { %p763_p3 = por %p762_p2, %p761_p1 }
  0x20   : > { %663 = vmatpush3.bf16.xpose.msra.mxu0 %v356_v4 }
  0x21   : > { %664 = vmatprep.subr.bf16.mxu0 %v888_v1  ;;  %p764_p5 = pnand %p763_p3, %p757_p0 }
  0x28   : > { %665 = vmatpush3.bf16.xpose.msra.mxu0 %v353_v6 }
  0x29   : > { %666 = vmatprep.subr.bf16.mxu0 %v888_v1 }
  0x30   : > { %667 = vmatpush3.bf16.xpose.msra.mxu0 %v350_v8 }
  0x31   : > { %668 = vmatprep.subr.bf16.mxu0 %v888_v1 }
  0x38   : > { %669 = vmatpush3.bf16.xpose.msra.mxu0 %v347_v10 }
  0x39   : > { %670 = vmatprep.subr.bf16.mxu0 %v888_v1 }
  0x40   : > { %671 = vmatpush3.bf16.xpose.msra.mxu0 %v344_v12 }
  0x47   : > { %673 = vmatmul.mubr.msk.bf16.vlgmr.msra.gmra.mxu0 %vm339_vm0, %v296_v14 }
 0x107   : > { %v395_v15 = vpop.f32.mrf.mxu0 }
 0x108   : > { %v401_v16 = vpack.c.bf16 %v395_v15, %v395_v15 }
 0x109   : > { %v674_v17 = vpop.f32.mrf.mxu0 }
 0x10a   : > { %412 = vrot.lane.b32.xlu1 %v401_v16, %s890_s20  ;;  %407 = vrot.lane.b32.xlu0 %v401_v16, %s891_s28  ;;  %403 = vst.msk [vmem:[%s272_s15] sm:$0xf] %vm402_vm2, %v401_v16 }
 0x10b   : > { %v398_v18 = vpop.f32.mrf.mxu0 }
 0x10c   : > { %767 = shalt.err (!%p764_p5)
}
 0x10d   : > { %s768_s14 = scalar_lea.hbm %s1030_s19, 64  ;;  %s772_s18 = scalar_lea.hbm %s1159_s4, 128 }
 0x10e   : > { %p769_p6 = scmp.ne.s32.totalorder %s1030_s19, %s768_s14  ;;  %p773_p10 = scmp.lt.s32.totalorder %s1030_s19, %s1159_s4 }
 0x10f   : > { %p774_p11 = scmp.lt.s32.totalorder %s772_s18, %s768_s14 }
 0x110   : > { %p770_p7 = pnand %p769_p6, %p975_p4 }
 0x111   : > { %p775_p12 = por %p774_p11, %p773_p10 }
 0x112   : > { %p771_p9 = pneg %p770_p7 }
 0x114   : > { %p776_p13 = pnand %p775_p12, %p771_p9 }
 0x116   : > { %779 = shalt.err (!%p776_p13)
}
 0x117   : > { %676 = dma.vmem_to_hbm [thread:$0]  (%p975_p4), %s1032_s16, 64, %s1030_s19, %s427_s30   ;;  %v675_v19 = vpop.f32.mrf.mxu0  ;;  %vm410_vm3 = vcmask 125952  }
 0x118   : > { %s893_s9 = smov 48   ;;  %s894_s11 = smov 80  }
 0x119   : > { %421 = vrot.lane.b32.xlu1 %v401_v16, %s893_s9  ;;  %416 = vrot.lane.b32.xlu0 %v401_v16, %s894_s11  ;;  %s627_s13 = sshll.u32 %s1023_s12, 3  ;;  %s1059_s17 = sand.u32 1, %s621_s25  }
 0x11a   : > { %s279_s15 = scalar_lea.vmem [#allocation4], %s627_s13  ;;  %s651_s18 = sshll.u32 %s878_s3, 7 }
 0x11b   : > { %s465_s14 = sshll.u32 %s279_s15, 4  ;;  %s286_s28 = scalar_lea.vmem [#allocation6], %s627_s13  ;;  %s1064_s14 = int_to_ptr.vmem [resolvable:$true] %s465_s14 }
 0x11c   : > { %s482_s16 = sshll.u32 %s286_s28, 4  ;;  %s1069_s25 = scalar_lea.hbm %s1160_s5, %s651_s18  ;;  %s1071_s16 = int_to_ptr.vmem [resolvable:$true] %s482_s16 }
 0x11d   : > { %s1076_s10 = scalar_lea.hbm %s1161_s6, %s651_s18  ;;  %s432_s9 = scalar_lea.sflag [#allocation5], %s1059_s17 }
 0x11e   : > { %s780_s11 = scalar_lea.vmem %s1064_s14, 128  ;;  %s895_s13 = smov [#allocation4]  }
 0x11f   : > { %p781_p0 = scmp.ne.s32.totalorder %s1064_s14, %s780_s11  ;;  %s784_s12 = sshll.u32 %s895_s13, 4  ;;  %s785_s12 = int_to_ptr.vmem [resolvable:$false] %s784_s12 }
 0x120   : > { %s786_s19 = scalar_lea.vmem %s785_s12, 256  ;;  %p787_p3 = scmp.lt.s32.totalorder %s1064_s14, %s785_s12 }
 0x121   : > { %p782_p1 = pnand %p781_p0, %p975_p4  ;;  %p788_p5 = scmp.lt.s32.totalorder %s786_s19, %s780_s11 }
 0x123   : > { %p783_p2 = pneg %p782_p1  ;;  %p789_p6 = por %p788_p5, %p787_p3 }
 0x125   : > { %p790_p7 = pnand %p789_p6, %p783_p2 }
 0x17c   : > { %v413_v20 = vpop.permute.xlu1 %412  ;;  %v408_v21 = vpop.permute.xlu0 %407 }
 0x17d   : > { %415 = vst.msk [vmem:[%s286_s28] sm:$0xf] %vm410_vm3, %v413_v20  ;;  %411 = vst.msk [vmem:[%s279_s15] sm:$0xf] %vm410_vm3, %v408_v21 }
 0x18b   : > { %v422_v22 = vpop.permute.xlu1 %421  ;;  %v417_v23 = vpop.permute.xlu0 %416 }
 0x18c   : > { %639 = vst.msk [vmem:[%s286_s28 + $0x4] sm:$0xf] %vm410_vm3, %v422_v22  ;;  %638 = vst.msk [vmem:[%s279_s15 + $0x4] sm:$0xf] %vm410_vm3, %v417_v23 }
 0x18d   : > { %793 = shalt.err (!%p790_p7)
}
 0x18e   : > { %s794_s15 = scalar_lea.hbm %s1069_s25, 128  ;;  %s798_s3 = scalar_lea.hbm %s1160_s5, 256 }
 0x18f   : > { %p795_p9 = scmp.ne.s32.totalorder %s1069_s25, %s794_s15  ;;  %p799_p12 = scmp.lt.s32.totalorder %s1069_s25, %s1160_s5 }
 0x190   : > { %p800_p13 = scmp.lt.s32.totalorder %s798_s3, %s794_s15 }
 0x191   : > { %p796_p10 = pnand %p795_p9, %p975_p4 }
 0x192   : > { %p801_p0 = por %p800_p13, %p799_p12 }
 0x193   : > { %p797_p11 = pneg %p796_p10 }
 0x195   : > { %p802_p1 = pnand %p801_p0, %p797_p11 }
 0x197   : > { %805 = shalt.err (!%p802_p1)
}
 0x198   : > { %s896_s11 = smov 4   ;;  %s806_s12 = scalar_lea.vmem %s1071_s16, 128 }
 0x199   : > { %677 = dma.vmem_to_hbm [thread:$0]  (%p975_p4), %s1064_s14, 128, %s1069_s25, %s432_s9, %s890_s20, %s890_s20, %s896_s11  }
 0x19a   : > { %p807_p2 = scmp.ne.s32.totalorder %s1071_s16, %s806_s12  ;;  %s897_s19 = smov [#allocation6]  }
 0x19b   : > { %s810_s15 = sshll.u32 %s897_s19, 4  ;;  %s811_s15 = int_to_ptr.vmem [resolvable:$false] %s810_s15 }
 0x19c   : > { %p808_p3 = pnand %p807_p2, %p975_p4  ;;  %s812_s18 = scalar_lea.vmem %s811_s15, 256 }
 0x19d   : > { %p813_p6 = scmp.lt.s32.totalorder %s1071_s16, %s811_s15  ;;  %p814_p7 = scmp.lt.s32.totalorder %s812_s18, %s806_s12 }
 0x19e   : > { %p809_p5 = pneg %p808_p3 }
 0x19f   : > { %p815_p9 = por %p814_p7, %p813_p6 }
 0x1a1   : > { %p816_p10 = pnand %p815_p9, %p809_p5 }
 0x1a3   : > { %819 = shalt.err (!%p816_p10)
}
 0x1a4   : > { %s820_s28 = scalar_lea.hbm %s1076_s10, 128  ;;  %s824_s3 = scalar_lea.hbm %s1161_s6, 256 }
 0x1a5   : > { %p821_p11 = scmp.ne.s32.totalorder %s1076_s10, %s820_s28  ;;  %p825_p0 = scmp.lt.s32.totalorder %s1076_s10, %s1161_s6 }
 0x1a6   : > { %p826_p1 = scmp.lt.s32.totalorder %s824_s3, %s820_s28 }
 0x1a7   : > { %p822_p12 = pnand %p821_p11, %p975_p4 }
 0x1a8   : > { %p827_p2 = por %p826_p1, %p825_p0 }
 0x1a9   : > { %p823_p13 = pneg %p822_p12 }
 0x1ab   : > { %p828_p3 = pnand %p827_p2, %p823_p13 }
 0x1ad   : > { %831 = shalt.err (!%p828_p3)
}
 0x1ae   : > { %678 = dma.vmem_to_hbm [thread:$0]  (%p975_p4), %s1071_s16, 128, %s1076_s10, %s432_s9, %s890_s20, %s890_s20, %s896_s11  }
 0x1af PF: > { %p692_p5 = scmp.ge.s32.totalorder %s886_s24, 2  ;;  %s497_s12 = sand.u32 1, %s866_s21  }
 0x1b0   : > { %s498_s19 = scalar_lea.sflag [#allocation3], %s497_s12 }
 0x1b1   : > { %p683_p6 = pnand %p692_p5, %p984_p8 }
 0x1b3   : > { %p684_p7 = pneg %p683_p6 }
 0x1b5   : > { %857 = dma.done.wait (%p684_p7), %s498_s19, 64  }
 0x1b6   : > { %859 = vsyncadd (%p684_p7), %s498_s19, 4294967232  ;;  %s506_s29 = sand.u32 1, %s622_s26  }
 0x1b7   : > { %s507_s15 = scalar_lea.sflag [#allocation5], %s506_s29 }
 0x1b8   : > { %861 = dma.done.wait (%p684_p7), %s507_s15, 256  }
 0x1b9   : > { %863 = vsyncadd (%p684_p7), %s507_s15, 4294967040  ;;  %s23_s24 = sadd.s32 1, %s886_s24   ;;  %s1164_s21 = smov %s870_s22 }
 0x1ba   : > { %p20_p4 = scmp.ge.s32.totalorder %s23_s24, 4   ;;  %s1165_s22 = smov %s874_s2 }
 0x1bb   : > { %s1166_s2 = smov %s990_s8  ;;  %s1167_s3 = smov %s882_s23 }
 0x1bc   : > { %s1168_s23 = smov %s1170_s27  ;;  %22 = sbr.rel (!%p20_p4) target bundleno = 6 (0x6), region = 105 }
 0x1c1   :  { %521 = vsyncpa [#allocation3], 1 }
 0x1c2   :  { %523 = vsyncpa [#allocation3 + $0x1], 1 }
 0x1c3   :  { %524 = vsyncpa [#allocation5], 1 }
 0x1c4   :  { %526 = vsyncpa [#allocation5 + $0x1], 1 }

</bundles_post_ra>
